<compile_context>
chip_gen: v7x
topology: tpu7x:2x2x1
jax: 0.10.0
libtpu: 0.0.40
codegen_flags: <defaults>
</compile_context>

<pallas_src>
import functools
import math

import jax
import jax.numpy as jnp
from jax.experimental import pallas as pl
from jax.experimental.pallas import tpu as pltpu


def _round_up(x, m):
    return (x + m - 1) // m * m


def _clamp_vmem(nbytes):
    return int(min(max(nbytes, 16 * 1024 * 1024), 48 * 1024 * 1024))


def _proj_vmem_bytes(n_k, tm, hp, n6h):
    per_step = (n_k * tm * hp * 4          # x block (f32)
                + n_k * hp * n6h * 2       # W_ih (bf16, resident)
                + 8 * n6h * 4              # bias (sublane padded)
                + tm * n6h * 4)            # out block
    return _clamp_vmem(2 * per_step + (2 << 20))


def _rec_vmem_bytes(block_t, bp, hp):
    per_step = (block_t * bp * 3 * hp * 4  # xg block
                + hp * 3 * hp * 2          # W_hh (bf16)
                + 8 * hp * 4               # b_hh_n (sublane padded)
                + bp * 128 * 4             # lengths (lane padded)
                + bp * hp * 4              # h0
                + block_t * bp * hp * 4    # y block
                + bp * hp * 4)             # h_final
    return _clamp_vmem(2 * per_step + bp * hp * 4 + (2 << 20))


# ----------------------------------------------------------------------------
# Pallas kernel 1: hoisted input-side projection for both directions.
#   xg = sum_k x[k] @ W[k] + b      (k = input chunks; 1 for layer 0, 2 after)
# Runs at full MXU occupancy (M = tm rows per grid step, bf16 operands).
# ----------------------------------------------------------------------------
def _xproj_kernel(x_ref, w_ref, b_ref, o_ref):
    n_k = x_ref.shape[0]
    acc = jnp.zeros(o_ref.shape, jnp.float32)
    for k in range(n_k):  # static, tiny (<=2)
        acc = acc + jnp.dot(x_ref[k].astype(jnp.bfloat16), w_ref[k],
                            preferred_element_type=jnp.float32)
    o_ref[...] = acc + b_ref[...]


def input_projection(x_nk, w_proj, b_proj, *, tm):
    """x_nk: (n_k, M, Hp) f32; w_proj: (n_k, Hp, 6Hp) bf16; b_proj: (1, 6Hp) f32.
    Returns xg: (M, 6Hp) f32 with [fw gates | bw gates] along the last dim."""
    n_k, m_total, hp = x_nk.shape
    n6h = w_proj.shape[-1]
    return pl.pallas_call(
        _xproj_kernel,
        out_shape=jax.ShapeDtypeStruct((m_total, n6h), jnp.float32),
        grid=(m_total // tm,),
        in_specs=[
            pl.BlockSpec((n_k, tm, hp), lambda m: (0, m, 0)),
            pl.BlockSpec((n_k, hp, n6h), lambda m: (0, 0, 0)),
            pl.BlockSpec((1, n6h), lambda m: (0, 0)),
        ],
        out_specs=pl.BlockSpec((tm, n6h), lambda m: (m, 0)),
        compiler_params=pltpu.CompilerParams(
            dimension_semantics=("parallel",),
            vmem_limit_bytes=_proj_vmem_bytes(n_k, tm, hp, n6h)),
    )(x_nk, w_proj, b_proj)


# ----------------------------------------------------------------------------
# Pallas kernel 2: bidirectional GRU recurrence.
# grid = (2, T_pad // block_t); axis 0 = direction, axis 1 = time blocks.
# Gate order (r, z, n) matches PyTorch nn.GRU.
# ----------------------------------------------------------------------------
def _bigru_rec_kernel(len_ref, xg_ref, whh_ref, bhn_ref, h0_ref,
                      y_ref, hN_ref, h_scr, *, block_t, hp, t_pad):
    d = pl.program_id(0)          # 0 = forward, 1 = backward
    i = pl.program_id(1)          # time-block index in scan order
    n_tb = pl.num_programs(1)
    bp = h_scr.shape[0]

    @pl.when(i == 0)
    def _():
        h_scr[...] = h0_ref[...]  # (re)start the recurrence for this direction

    w_hh = whh_ref[...]                                   # (Hp, 3Hp) bf16
    b_hn = jnp.broadcast_to(bhn_ref[...], (bp, hp))       # hoisted broadcast
    lens = len_ref[...]                                   # (Bp, 1) int32

    def step(j, carry):
        # forward scans local slots 0..block_t-1, backward scans them reversed
        local = j + d * (block_t - 1 - 2 * j)
        t_scan = i * block_t + j
        pos = t_scan + d * ((t_pad - 1) - 2 * t_scan)     # global time position

        h = h_scr[...]                                    # (Bp, Hp) f32
        xg_t = xg_ref[local]                              # (Bp, 3Hp) f32
        hg = jnp.dot(h.astype(jnp.bfloat16), w_hh,
                     preferred_element_type=jnp.float32)  # (Bp, 3Hp) f32

        r = jax.nn.sigmoid(xg_t[:, 0:hp] + hg[:, 0:hp])
        z = jax.nn.sigmoid(xg_t[:, hp:2 * hp] + hg[:, hp:2 * hp])
        n = jnp.tanh(xg_t[:, 2 * hp:] + r * (hg[:, 2 * hp:] + b_hn))
        h_new = (1.0 - z) * n + z * h

        valid = pos < lens                                # (Bp, 1) bool
        h_scr[...] = jnp.where(valid, h_new, h)           # freeze h past length
        y_ref[local] = jnp.where(valid, h_new, 0.0)       # pad_packed -> zeros
        return carry

    jax.lax.fori_loop(0, block_t, step, 0, unroll=True)

    @pl.when(i == n_tb - 1)
    def _():
        hN_ref[...] = h_scr[...]                          # final hidden, once


def gru_bidir_recurrence(xg, lens_col, whh, bhn, h0, *, block_t):
    """xg: (Tp, Bp, 6Hp) f32   lens_col: (Bp, 1) int32
    whh: (2, Hp, 3Hp) bf16     bhn: (2, 1, Hp) f32      h0: (2, Bp, Hp) f32
    returns y: (2, Tp, Bp, Hp) f32, h_final: (2, Bp, Hp) f32"""
    t_pad, bp, six_hp = xg.shape
    hp = six_hp // 6
    n_tb = t_pad // block_t

    def t_block(d, i):            # forward: block i; backward: block n_tb-1-i
        return i + d * (n_tb - 1 - 2 * i)

    kernel = functools.partial(_bigru_rec_kernel,
                               block_t=block_t, hp=hp, t_pad=t_pad)

    y, h_final = pl.pallas_call(
        kernel,
        out_shape=(jax.ShapeDtypeStruct((2, t_pad, bp, hp), jnp.float32),
                   jax.ShapeDtypeStruct((2, bp, hp), jnp.float32)),
        grid=(2, n_tb),
        in_specs=[
            pl.BlockSpec((bp, 1), lambda d, i: (0, 0)),                  # lengths
            pl.BlockSpec((block_t, bp, 3 * hp),
                         lambda d, i: (t_block(d, i), 0, d)),            # xg half
            pl.BlockSpec((None, hp, 3 * hp), lambda d, i: (d, 0, 0)),    # W_hh
            pl.BlockSpec((None, 1, hp), lambda d, i: (d, 0, 0)),         # b_hh_n
            pl.BlockSpec((None, bp, hp), lambda d, i: (d, 0, 0)),        # h0
        ],
        out_specs=(
            pl.BlockSpec((None, block_t, bp, hp),
                         lambda d, i: (d, t_block(d, i), 0, 0)),         # y
            pl.BlockSpec((None, bp, hp), lambda d, i: (d, 0, 0)),        # h final
        ),
        scratch_shapes=[pltpu.VMEM((bp, hp), jnp.float32)],              # h state
        compiler_params=pltpu.CompilerParams(
            dimension_semantics=("parallel", "arbitrary"),
            vmem_limit_bytes=_rec_vmem_bytes(block_t, bp, hp)),
    )(lens_col, xg, whh, bhn, h0)
    return y, h_final


# ----------------------------------------------------------------------------
# Parameter packing: PyTorch GRU layout -> padded, gate-fused kernel layout.
# ----------------------------------------------------------------------------
def _pack_dir_params(w_ih, w_hh, b_ih, b_hh, H, Hp, first_layer):
    din_p = Hp if first_layer else 2 * Hp
    wih_p = jnp.zeros((din_p, 3 * Hp), jnp.float32)
    whh_p = jnp.zeros((Hp, 3 * Hp), jnp.float32)
    bx_p = jnp.zeros((1, 3 * Hp), jnp.float32)
    for g in range(3):                                   # gates r, z, n
        wg = w_ih[g * H:(g + 1) * H, :].T                # (Din, H)
        if first_layer:
            wih_p = wih_p.at[0:H, g * Hp:g * Hp + H].set(wg)
        else:
            # next-layer input is (y_fw | y_bw): real rows sit at [0:H]
            # (forward half, K-chunk 0) and [Hp:Hp+H] (backward half, chunk 1).
            wih_p = wih_p.at[0:H, g * Hp:g * Hp + H].set(wg[0:H])
            wih_p = wih_p.at[Hp:Hp + H, g * Hp:g * Hp + H].set(wg[H:2 * H])
        whh_p = whh_p.at[0:H, g * Hp:g * Hp + H].set(w_hh[g * H:(g + 1) * H, :].T)
        bg = b_ih[g * H:(g + 1) * H]
        if g < 2:                                        # b_hh folds in for r, z
            bg = bg + b_hh[g * H:(g + 1) * H]
        bx_p = bx_p.at[0, g * Hp:g * Hp + H].set(bg)
    bhn_p = jnp.zeros((1, Hp), jnp.float32).at[0, 0:H].set(b_hh[2 * H:3 * H])
    return wih_p, whh_p, bx_p, bhn_p


def _pack_layer_params(params, layer, H, Hp):
    packed = {}
    for d in ("fw", "bw"):
        packed[d] = _pack_dir_params(
            params[f"w_ih_l{layer}_{d}"], params[f"w_hh_l{layer}_{d}"],
            params[f"b_ih_l{layer}_{d}"], params[f"b_hh_l{layer}_{d}"],
            H, Hp, layer == 0)
    wih_fw, whh_fw, bx_fw, bhn_fw = packed["fw"]
    wih_bw, whh_bw, bx_bw, bhn_bw = packed["bw"]
    din_p = wih_fw.shape[0]
    # projection weights: columns [0:3Hp]=fw gates, [3Hp:6Hp]=bw gates;
    # rows split into n_k = din_p // Hp input chunks (1 for layer 0, 2 after).
    w_proj = jnp.concatenate([wih_fw, wih_bw], axis=1)          # (din_p, 6Hp)
    w_proj = w_proj.reshape(din_p // Hp, Hp, 6 * Hp).astype(jnp.bfloat16)
    b_proj = jnp.concatenate([bx_fw, bx_bw], axis=1)            # (1, 6Hp)
    whh = jnp.stack([whh_fw, whh_bw]).astype(jnp.bfloat16)      # (2, Hp, 3Hp)
    bhn = jnp.stack([bhn_fw, bhn_bw])                           # (2, 1, Hp)
    return w_proj, b_proj, whh, bhn


# ----------------------------------------------------------------------------
# EncoderRNN forward (embedding gather + padding glue in JAX, GRU in Pallas)
# ----------------------------------------------------------------------------
def encoder_rnn_forward(params, input_seq, input_lengths, n_layers,
                        hidden=None, *, block_t=32):
    T, B = input_seq.shape
    H = params["embedding"].shape[1]
    Hp = _round_up(H, 128)        # lane-dense last dim
    Bp = _round_up(B, 8)          # full sublane occupancy
    bt = min(block_t, _round_up(T, 8))
    Tp = _round_up(T, bt)

    # self.embedding(input_seq): gather straight into the padded layout
    # (padded feature dim on the table, padded (Tp,Bp) token-id grid).
    # Padded positions embed token 0 but are masked out by the length check.
    emb_tab = jnp.zeros((params["embedding"].shape[0], Hp), jnp.float32
                        ).at[:, :H].set(params["embedding"])
    ids_pad = jnp.zeros((Tp, Bp), jnp.int32).at[:T, :B].set(
        input_seq.astype(jnp.int32))
    x_nk = jnp.take(emb_tab, ids_pad.reshape(-1), axis=0
                    ).reshape(1, Tp * Bp, Hp)

    # pack_padded_sequence(enforce_sorted=False): lengths drive an in-kernel
    # validity mask; padded batch rows get length 0 and stay identically zero.
    lens_col = jnp.zeros((Bp, 1), jnp.int32).at[:B, 0].set(
        input_lengths.astype(jnp.int32))

    if hidden is None:
        hidden = jnp.zeros((2 * n_layers, B, H), jnp.float32)

    h_finals = []
    y = None
    for l in range(n_layers):
        w_proj, b_proj, whh, bhn = _pack_layer_params(params, l, H, Hp)
        h0 = jnp.zeros((2, Bp, Hp), jnp.float32).at[:, :B, :H].set(
            hidden[2 * l:2 * l + 2])
        # hoisted input GEMM for the whole layer (full MXU occupancy)
        xg = input_projection(x_nk, w_proj, b_proj, tm=bt * Bp)   # (Tp*Bp, 6Hp)
        xg = xg.reshape(Tp, Bp, 6 * Hp)                           # free reshape
        y, hN = gru_bidir_recurrence(xg, lens_col, whh, bhn, h0, block_t=bt)
        h_finals.append(hN[:, :B, :H])
        if l + 1 < n_layers:
            # next-layer input as two K-chunks (fw, bw) -- no concat copy.
            x_nk = y.reshape(2, Tp * Bp, Hp)
        # TODO(synk): inter-layer GRU dropout omitted (eval-mode identity).

    # outputs[:, :, :H] + outputs[:, :, H:]  == forward + backward of last layer
    outputs = (y[0] + y[1])[:T, :B, :H]
    hidden_out = jnp.concatenate(h_finals, axis=0)                # (2L, B, H)
    return outputs, hidden_out


# ----------------------------------------------------------------------------
# Deterministic parameter init (PyTorch nn.Embedding + nn.GRU shapes/layout)
# ----------------------------------------------------------------------------
def init_params(key, num_words, hidden_size, n_layers):
    params = {}
    key, k_emb = jax.random.split(key)
    params["embedding"] = 0.1 * jax.random.normal(
        k_emb, (num_words, hidden_size), jnp.float32)
    bound = 1.0 / math.sqrt(hidden_size)
    for l in range(n_layers):
        d_in = hidden_size if l == 0 else 2 * hidden_size
        for d in ("fw", "bw"):
            key, k1, k2, k3, k4 = jax.random.split(key, 5)
            params[f"w_ih_l{l}_{d}"] = jax.random.uniform(
                k1, (3 * hidden_size, d_in), jnp.float32, -bound, bound)
            params[f"w_hh_l{l}_{d}"] = jax.random.uniform(
                k2, (3 * hidden_size, hidden_size), jnp.float32, -bound, bound)
            params[f"b_ih_l{l}_{d}"] = jax.random.uniform(
                k3, (3 * hidden_size,), jnp.float32, -bound, bound)
            params[f"b_hh_l{l}_{d}"] = jax.random.uniform(
                k4, (3 * hidden_size,), jnp.float32, -bound, bound)
    return params


# ----------------------------------------------------------------------------
# Pure-JAX reference (numerical sanity check of the Pallas path)
# ----------------------------------------------------------------------------
def _ref_gru_dir(x, mask, w_ih, w_hh, b_ih, b_hh, h0, reverse):
    T = x.shape[0]
    H = w_hh.shape[1]
    prec = jax.lax.Precision.HIGHEST

    def gate(w, b, v, g):
        return (jnp.dot(v, w[g * H:(g + 1) * H, :].T, precision=prec)
                + b[g * H:(g + 1) * H])

    h = h0
    ys = [None] * T
    order = range(T - 1, -1, -1) if reverse else range(T)
    for t in order:
        xt, mt = x[t], mask[t]
        r = jax.nn.sigmoid(gate(w_ih, b_ih, xt, 0) + gate(w_hh, b_hh, h, 0))
        z = jax.nn.sigmoid(gate(w_ih, b_ih, xt, 1) + gate(w_hh, b_hh, h, 1))
        n = jnp.tanh(gate(w_ih, b_ih, xt, 2) + r * gate(w_hh, b_hh, h, 2))
        h_new = (1.0 - z) * n + z * h
        h = mt * h_new + (1.0 - mt) * h
        ys[t] = mt * h_new
    return jnp.stack(ys, 0), h


def _ref_forward(params, input_seq, input_lengths, n_layers):
    T, B = input_seq.shape
    x = jnp.take(params["embedding"], input_seq, axis=0)
    mask = (jnp.arange(T)[:, None] < input_lengths[None, :]
            ).astype(jnp.float32)[..., None]
    H = params["embedding"].shape[1]
    hidden = jnp.zeros((2 * n_layers, B, H), jnp.float32)
    h_finals = []
    yf = yb = None
    for l in range(n_layers):
        yf, hf = _ref_gru_dir(x, mask, params[f"w_ih_l{l}_fw"],
                              params[f"w_hh_l{l}_fw"], params[f"b_ih_l{l}_fw"],
                              params[f"b_hh_l{l}_fw"], hidden[2 * l], False)
        yb, hb = _ref_gru_dir(x, mask, params[f"w_ih_l{l}_bw"],
                              params[f"w_hh_l{l}_bw"], params[f"b_ih_l{l}_bw"],
                              params[f"b_hh_l{l}_bw"], hidden[2 * l + 1], True)
        h_finals += [hf, hb]
        x = jnp.concatenate([yf, yb], axis=-1)
    return yf + yb, jnp.stack(h_finals, 0)


def _check(params, input_seq, input_lengths, n_layers, block_t, tag):
    outputs, hidden = encoder_rnn_forward(params, input_seq, input_lengths,
                                          n_layers, block_t=block_t)
    outputs, hidden = jax.block_until_ready((outputs, hidden))
    T, B = input_seq.shape
    H = params["embedding"].shape[1]
    assert outputs.shape == (T, B, H), tag
    assert hidden.shape == (2 * n_layers, B, H), tag
    ref_out, ref_hid = _ref_forward(params, input_seq, input_lengths, n_layers)
    # bf16 MXU operands with f32 accumulation -> slightly looser tolerance.
    assert jnp.allclose(outputs, ref_out, atol=1e-2, rtol=1e-2), f"{tag}: outputs"
    assert jnp.allclose(hidden, ref_hid, atol=1e-2, rtol=1e-2), f"{tag}: hidden"


if __name__ == "__main__":
    NUM_WORDS, N_LAYERS, H = 50, 2, 32
    params = init_params(jax.random.PRNGKey(0), NUM_WORDS, H, N_LAYERS)

    # Case A: small batch, T divisible by the (clamped) time block.
    T, B = 8, 4
    seq_a = jax.random.randint(jax.random.PRNGKey(1), (T, B), 0, NUM_WORDS,
                               dtype=jnp.int32)
    len_a = jnp.array([8, 6, 4, 3], dtype=jnp.int32)   # enforce_sorted=False ok
    _check(params, seq_a, len_a, N_LAYERS, block_t=32, tag="caseA")

    # Case B: T not divisible by block_t, B > 8 (padded time + padded batch,
    # multiple time blocks per direction).
    T, B = 10, 9
    seq_b = jax.random.randint(jax.random.PRNGKey(2), (T, B), 0, NUM_WORDS,
                               dtype=jnp.int32)
    len_b = jnp.array([10, 9, 7, 5, 4, 3, 2, 1, 6], dtype=jnp.int32)
    _check(params, seq_b, len_b, N_LAYERS, block_t=8, tag="caseB")

    print("KERNEL_OK")
</pallas_src>

<mosaic_0001>
module attributes {stable_mosaic.version = 11 : i64} {
  func.func @_xproj_kernel(%arg0: i32, %arg1: memref<1x64x128xf32, #tpu.memory_space<vmem>>, %arg2: memref<1x128x768xbf16, #tpu.memory_space<vmem>>, %arg3: memref<1x768xf32, #tpu.memory_space<vmem>>, %arg4: memref<64x768xf32, #tpu.memory_space<vmem>>) attributes {dimension_semantics = [#tpu.dimension_semantics<parallel>], iteration_bounds = array<i64: 1>, scalar_prefetch = 0 : i64, scratch_operands = 0 : i64, tpu.core_type = #tpu.core_type<tc>, window_params = [{transform_indices = @transform_0, window_bounds = array<i64: 1, 64, 128>}, {pipeline_mode = #tpu.pipeline_mode<synchronous>, transform_indices = @transform_1, window_bounds = array<i64: 1, 128, 768>}, {pipeline_mode = #tpu.pipeline_mode<synchronous>, transform_indices = @transform_2, window_bounds = array<i64: 1, 768>}, {transform_indices = @transform_3, window_bounds = array<i64: 64, 768>}]} {
    %cst = arith.constant 0.000000e+00 : f32
    %0 = vector.broadcast %cst : f32 to vector<64x768xf32>
    %c0 = arith.constant 0 : index
    %c0_0 = arith.constant 0 : index
    %c0_1 = arith.constant 0 : index
    %1 = vector.load %arg1[%c0, %c0_0, %c0_1] : memref<1x64x128xf32, #tpu.memory_space<vmem>>, vector<1x64x128xf32>
    %2 = vector.shape_cast %1 : vector<1x64x128xf32> to vector<64x128xf32>
    %3 = arith.truncf %2 : vector<64x128xf32> to vector<64x128xbf16>
    %c0_2 = arith.constant 0 : index
    %c0_3 = arith.constant 0 : index
    %c0_4 = arith.constant 0 : index
    %4 = vector.load %arg2[%c0_2, %c0_3, %c0_4] : memref<1x128x768xbf16, #tpu.memory_space<vmem>>, vector<1x128x768xbf16>
    %5 = vector.shape_cast %4 : vector<1x128x768xbf16> to vector<128x768xbf16>
    %cst_5 = arith.constant dense<0.000000e+00> : vector<64x768xf32>
    %6 = tpu.matmul %3, %5, %cst_5 {dimension_numbers = #tpu.dot_dimension_numbers<[1], [0], [0], [1], [0, 0, 1, 1], [], []>} : vector<64x128xbf16>, vector<128x768xbf16>, vector<64x768xf32> -> vector<64x768xf32>
    %7 = arith.addf %0, %6 : vector<64x768xf32>
    %c0_6 = arith.constant 0 : index
    %c0_7 = arith.constant 0 : index
    %8 = vector.load %arg3[%c0_6, %c0_7] : memref<1x768xf32, #tpu.memory_space<vmem>>, vector<1x768xf32>
    %9 = vector.broadcast %8 : vector<1x768xf32> to vector<64x768xf32>
    %10 = arith.addf %7, %9 : vector<64x768xf32>
    %c0_8 = arith.constant 0 : index
    %c0_9 = arith.constant 0 : index
    %11 = vector.load %arg4[%c0_8, %c0_9] : memref<64x768xf32, #tpu.memory_space<vmem>>, vector<64x768xf32>
    tpu.vector_store %arg4[%c0_8, %c0_9], %10 {strides = array<i32>} : memref<64x768xf32, #tpu.memory_space<vmem>>, vector<64x768xf32>,
    return
  }
  func.func @transform_0(%arg0: i32) -> (i32, i32, i32) {
    %c0_i32 = arith.constant 0 : i32
    %c0_i32_0 = arith.constant 0 : i32
    %c0_i32_1 = arith.constant 0 : i32
    return %c0_i32, %arg0, %c0_i32_0 : i32, i32, i32
  }
  func.func @transform_1(%arg0: i32) -> (i32, i32, i32) {
    %c0_i32 = arith.constant 0 : i32
    %c0_i32_0 = arith.constant 0 : i32
    %c0_i32_1 = arith.constant 0 : i32
    %c0_i32_2 = arith.constant 0 : i32
    return %c0_i32, %c0_i32_0, %c0_i32_1 : i32, i32, i32
  }
  func.func @transform_2(%arg0: i32) -> (i32, i32) {
    %c0_i32 = arith.constant 0 : i32
    %c0_i32_0 = arith.constant 0 : i32
    %c0_i32_1 = arith.constant 0 : i32
    return %c0_i32, %c0_i32_0 : i32, i32
  }
  func.func @transform_3(%arg0: i32) -> (i32, i32) {
    %c0_i32 = arith.constant 0 : i32
    %c0_i32_0 = arith.constant 0 : i32
    return %arg0, %c0_i32 : i32, i32
  }
}

</mosaic_0001>

<bundles_post_ra>
// kernel: tpu_custom_call.1
= control target key start
LH: loop header
LB: loop body
LE: loop exit
PB: predicated region body
PF: predicated region fallthrough
CT: control target
= control target key end

     0   :  { %8 = vsyncpa [#allocation3], 0  ;;  %s1021_s0 = inlined_call_operand.hbm [shape: f32[1,64,128], index: 0, kind: input, shape index: {}]   ;;  %s1022_s1 = inlined_call_operand.hbm [shape: bf16[1,128,768], index: 1, kind: input, shape index: {}]   ;;  %s1023_s2 = inlined_call_operand.vmem [shape: f32[1,768], index: 2, kind: input, shape index: {}]   ;;  %s1024_s3 = inlined_call_operand.hbm [shape: f32[64,768], index: 3, kind: output, shape index: {}]  }
   0x1   :  { %9 = vsyncpa [#allocation6], 0 }
   0x2   :  { %10 = vsyncpa [#allocation4], 0  ;;  %s879_s12 = smov [#allocation2]   ;;  %s807_s16 = scalar_lea.hbm %s1021_s0, 1024 }
   0x3   :  { %s16_s13 = sshll.u32 %s879_s12, 4  ;;  %p808_p0 = scmp.ne.s32.totalorder %s1021_s0, %s807_s16  ;;  %s17_s13 = int_to_ptr.vmem [resolvable:$true] %s16_s13 }
   0x4   :  { %p811_p1 = scmp.lt.u32.totalorder %s807_s16, %s1021_s0 }
   0x6   :  { %p813_p2 = pnand %p811_p1, %p808_p0 }
   0x8   :  { %816 = shalt.err (!%p813_p2)
}
   0x9   :  { %s817_s21 = scalar_lea.vmem %s17_s13, 1024  ;;  %p822_p4 = scmp.lt.s32.totalorder %s17_s13, %s17_s13 }
   0xa   :  { %p818_p3 = scmp.ne.s32.totalorder %s17_s13, %s817_s21  ;;  %p823_p5 = scmp.lt.s32.totalorder %s817_s21, %s817_s21 }
   0xc   :  { %p824_p6 = por %p823_p5, %p822_p4 }
   0xe   :  { %p825_p7 = pnand %p824_p6, %p818_p3 }
  0x10   :  { %828 = shalt.err (!%p825_p7)
}
  0x11   :  { %s880_s22 = smov 128   ;;  %s881_s23 = smov 8  }
  0x12   :  { %22 = dma.hbm_to_vmem [thread:$0]  %s1021_s0, 1024, %s17_s13, [#allocation3], %s880_s22, %s880_s22, %s881_s23  }
  0x13   :  { %s882_s26 = smov [#allocation5]   ;;  %s829_s30 = scalar_lea.hbm %s1022_s1, 6144 }
  0x14   :  { %s28_s27 = sshll.u32 %s882_s26, 4  ;;  %p830_p8 = scmp.ne.s32.totalorder %s1022_s1, %s829_s30  ;;  %s29_s27 = int_to_ptr.vmem [resolvable:$true] %s28_s27 }
  0x15   :  { %p833_p9 = scmp.lt.u32.totalorder %s829_s30, %s1022_s1 }
  0x17   :  { %p835_p10 = pnand %p833_p9, %p830_p8 }
  0x19   :  { %838 = shalt.err (!%p835_p10)
}
  0x1a   :  { %s839_s8 = scalar_lea.vmem %s29_s27, 6144  ;;  %p844_p12 = scmp.lt.s32.totalorder %s29_s27, %s29_s27 }
  0x1b   :  { %p840_p11 = scmp.ne.s32.totalorder %s29_s27, %s839_s8  ;;  %p845_p13 = scmp.lt.s32.totalorder %s839_s8, %s839_s8 }
  0x1d   :  { %p846_p0 = por %p845_p13, %p844_p12 }
  0x1f   :  { %p847_p1 = pnand %p846_p0, %p840_p11 }
  0x21   :  { %850 = shalt.err (!%p847_p1)
}
  0x22   :  { %s883_s0 = smov 384   ;;  %s884_s9 = smov 24  }
  0x23   :  { %34 = dma.hbm_to_vmem [thread:$0]  %s1022_s1, 6144, %s29_s27, [#allocation6], %s883_s0, %s883_s0, %s884_s9  }
  0x24   :  { %873 = dma.done.wait [#allocation3], 1024  }
  0x25   :  { %874 = vsyncadd [#allocation3], 4294966272 }
  0x26   :  { %875 = dma.done.wait [#allocation6], 6144  }
  0x27   :  { %876 = vsyncadd [#allocation6], 4294961152  ;;  %v885_v0 = vmov 0   ;;  %v735_v1 = vld [vmem:[#allocation5 + $0x4] ss:$24 sps:$4 sm:$0xff]   ;;  %v45_v34 = vld [vmem:[#allocation2 + $0x8] sm:$0xff]  ;;  %v106_v61 = vlaneseq }
  0x28   :  { %408 = vmatprep.mubr.bf16.mxu0 %v885_v0  ;;  %481 = vmatprep.mubr.bf16.mxu1 %v885_v0  ;;  %v737_v2 = vld [vmem:[#allocation5 + $0xc] ss:$24 sps:$4 sm:$0xff]   ;;  %v739_v3 = vld [vmem:[#allocation5] ss:$24 sps:$4 sm:$0xff]   ;;  %v743_v6 = vld [vmem:[#allocation5 + $0x3c] ss:$24 sps:$4 sm:$0xff]  }
  0x29   :  { %376 = vmatprep.subr.bf16.mxu0 %v735_v1  ;;  %v740_v4 = vld [vmem:[#allocation5 + $0x8] ss:$24 sps:$4 sm:$0xff]   ;;  %449 = vmatprep.subr.bf16.mxu1 %v737_v2  ;;  %v741_v5 = vld [vmem:[#allocation5 + $0x34] ss:$24 sps:$4 sm:$0xff]   ;;  %v746_v8 = vld [vmem:[#allocation5 + $0x38] ss:$24 sps:$4 sm:$0xff]  }
  0x2a   :  { %377 = vmatpush1.bf16.msra.mxu0 %v739_v3  ;;  %450 = vmatpush1.bf16.msra.mxu1 %v740_v4  ;;  %v745_v7 = vld [vmem:[#allocation5 + $0x30] ss:$24 sps:$4 sm:$0xff]   ;;  %v747_v9 = vld [vmem:[#allocation5 + $0x64] ss:$24 sps:$4 sm:$0xff]   ;;  %v751_v11 = vld [vmem:[#allocation5 + $0x60] ss:$24 sps:$4 sm:$0xff]  }
  0x2b   :  { %378 = vmatprep.subr.bf16.mxu0 %v741_v5  ;;  %451 = vmatprep.subr.bf16.mxu1 %v743_v6  ;;  %v749_v10 = vld [vmem:[#allocation5 + $0x6c] ss:$24 sps:$4 sm:$0xff]   ;;  %v752_v12 = vld [vmem:[#allocation5 + $0x68] ss:$24 sps:$4 sm:$0xff]   ;;  %v755_v14 = vld [vmem:[#allocation5 + $0x9c] ss:$24 sps:$4 sm:$0xff]  }
  0x2c   :  { %v753_v13 = vld [vmem:[#allocation5 + $0x94] ss:$24 sps:$4 sm:$0xff]   ;;  %v757_v15 = vld [vmem:[#allocation5 + $0x90] ss:$24 sps:$4 sm:$0xff]   ;;  %v759_v17 = vld [vmem:[#allocation5 + $0xc4] ss:$24 sps:$4 sm:$0xff]  }
  0x2d   :  { %v758_v16 = vld [vmem:[#allocation5 + $0x98] ss:$24 sps:$4 sm:$0xff]   ;;  %v761_v18 = vld [vmem:[#allocation5 + $0xcc] ss:$24 sps:$4 sm:$0xff]   ;;  %v764_v20 = vld [vmem:[#allocation5 + $0xc8] ss:$24 sps:$4 sm:$0xff]  }
  0x2e   :  { %379 = vmatpush1.bf16.msra.mxu0 %v745_v7  ;;  %452 = vmatpush1.bf16.msra.mxu1 %v746_v8  ;;  %v763_v19 = vld [vmem:[#allocation5 + $0xc0] ss:$24 sps:$4 sm:$0xff]   ;;  %v765_v21 = vld [vmem:[#allocation5 + $0xf4] ss:$24 sps:$4 sm:$0xff]   ;;  %v769_v23 = vld [vmem:[#allocation5 + $0xf0] ss:$24 sps:$4 sm:$0xff]  }
  0x2f   :  { %380 = vmatprep.subr.bf16.mxu0 %v747_v9  ;;  %453 = vmatprep.subr.bf16.mxu1 %v749_v10  ;;  %v767_v22 = vld [vmem:[#allocation5 + $0xfc] ss:$24 sps:$4 sm:$0xff]   ;;  %v770_v24 = vld [vmem:[#allocation5 + $0xf8] ss:$24 sps:$4 sm:$0xff]   ;;  %v773_v26 = vld [vmem:[#allocation5 + $0x12c] ss:$24 sps:$4 sm:$0xff]  }
  0x30   :  { %v771_v25 = vld [vmem:[#allocation5 + $0x124] ss:$24 sps:$4 sm:$0xff]   ;;  %v775_v27 = vld [vmem:[#allocation5 + $0x120] ss:$24 sps:$4 sm:$0xff]   ;;  %v777_v29 = vld [vmem:[#allocation5 + $0x154] ss:$24 sps:$4 sm:$0xff]  }
  0x31   :  { %v776_v28 = vld [vmem:[#allocation5 + $0x128] ss:$24 sps:$4 sm:$0xff]   ;;  %v779_v30 = vld [vmem:[#allocation5 + $0x15c] ss:$24 sps:$4 sm:$0xff]   ;;  %v782_v32 = vld [vmem:[#allocation5 + $0x158] ss:$24 sps:$4 sm:$0xff]  }
  0x32   :  { %381 = vmatpush1.bf16.msra.mxu0 %v751_v11  ;;  %454 = vmatpush1.bf16.msra.mxu1 %v752_v12  ;;  %v781_v31 = vld [vmem:[#allocation5 + $0x150] ss:$24 sps:$4 sm:$0xff]   ;;  %v44_v33 = vld [vmem:[#allocation2] sm:$0xff]  ;;  %v785_v35 = vld [vmem:[#allocation5 + $0x14] ss:$24 sps:$4 sm:$0xff]   ;;  %v950_v62 = vshrl.u32 %v106_v61, 7 }
  0x33   :  { %382 = vmatprep.subr.bf16.mxu0 %v753_v13  ;;  %455 = vmatprep.subr.bf16.mxu1 %v755_v14  ;;  %v935_v36 = vpack.c.bf16 %v45_v34, %v44_v33  ;;  %v783_v37 = vld [vmem:[#allocation5 + $0x10] ss:$24 sps:$4 sm:$0xff]   ;;  %v788_v38 = vld [vmem:[#allocation5 + $0x44] ss:$24 sps:$4 sm:$0xff]   ;;  %v786_v39 = vld [vmem:[#allocation5 + $0x40] ss:$24 sps:$4 sm:$0xff]  }
  0x34   :  { %v46_v40 = vld [vmem:[#allocation2 + $0x10] sm:$0xff]  ;;  %v47_v41 = vld [vmem:[#allocation2 + $0x18] sm:$0xff]  ;;  %v48_v47 = vld [vmem:[#allocation2 + $0x20] sm:$0xff]  ;;  %v108_v63 = vsub.s32 0, %v950_v62  ;;  %v116_v1 = vsub.s32 2, %v950_v62  ;;  %v112_v3 = vsub.s32 1, %v950_v62 }
  0x35   :  { %v791_v42 = vld [vmem:[#allocation5 + $0x74] ss:$24 sps:$4 sm:$0xff]   ;;  %v53_v43 = vpack.c.bf16 %v47_v41, %v46_v40  ;;  %v789_v44 = vld [vmem:[#allocation5 + $0x70] ss:$24 sps:$4 sm:$0xff]   ;;  %v794_v45 = vld [vmem:[#allocation5 + $0xa4] ss:$24 sps:$4 sm:$0xff]  }
  0x36   :  { %383 = vmatpush1.bf16.msra.mxu0 %v757_v15  ;;  %456 = vmatpush1.bf16.msra.mxu1 %v758_v16  ;;  %v792_v46 = vld [vmem:[#allocation5 + $0xa0] ss:$24 sps:$4 sm:$0xff]   ;;  %v49_v48 = vld [vmem:[#allocation2 + $0x28] sm:$0xff]  ;;  %v800_v52 = vld [vmem:[#allocation5 + $0x104] ss:$24 sps:$4 sm:$0xff]   ;;  %v120_v4 = vsub.s32 3, %v950_v62 }
  0x37   :  { %384 = vmatprep.subr.bf16.mxu0 %v759_v17  ;;  %457 = vmatprep.subr.bf16.mxu1 %v761_v18  ;;  %v797_v49 = vld [vmem:[#allocation5 + $0xd4] ss:$24 sps:$4 sm:$0xff]   ;;  %v54_v50 = vpack.c.bf16 %v49_v48, %v48_v47  ;;  %v795_v51 = vld [vmem:[#allocation5 + $0xd0] ss:$24 sps:$4 sm:$0xff]   ;;  %v798_v53 = vld [vmem:[#allocation5 + $0x100] ss:$24 sps:$4 sm:$0xff]  }
  0x38   :  { %v50_v54 = vld [vmem:[#allocation2 + $0x30] sm:$0xff]  ;;  %v51_v55 = vld [vmem:[#allocation2 + $0x38] sm:$0xff]  ;;  %v957_v2 = vld [vmem:[%s1023_s2] sm:$0x3f]  ;;  %s886_s2 = smov [#allocation7]  }
  0x39   :  { %v803_v56 = vld [vmem:[#allocation5 + $0x134] ss:$24 sps:$4 sm:$0xff]   ;;  %v55_v57 = vpack.c.bf16 %v51_v55, %v50_v54  ;;  %v801_v58 = vld [vmem:[#allocation5 + $0x130] ss:$24 sps:$4 sm:$0xff]   ;;  %v806_v59 = vld [vmem:[#allocation5 + $0x164] ss:$24 sps:$4 sm:$0xff]   ;;  %v965_v5 = vrot.slane %v957_v2, %v116_v1  ;;  %v968_v6 = vrot.slane %v957_v2, %v112_v3  ;;  %v971_v7 = vrot.slane %v957_v2, %v120_v4 }
  0x3a   :  { %385 = vmatpush1.bf16.msra.mxu0 %v763_v19  ;;  %458 = vmatpush1.bf16.msra.mxu1 %v764_v20  ;;  %v804_v60 = vld [vmem:[#allocation5 + $0x160] ss:$24 sps:$4 sm:$0xff]   ;;  %s648_s13 = sshll.u32 %s886_s2, 4  ;;  %s649_s13 = int_to_ptr.vmem [resolvable:$true] %s648_s13 }
  0x3b   :  { %386 = vmatprep.subr.bf16.mxu0 %v765_v21  ;;  %459 = vmatprep.subr.bf16.mxu1 %v767_v22  ;;  %s851_s14 = scalar_lea.vmem %s649_s13, 6144  ;;  %p856_p3 = scmp.lt.s32.totalorder %s649_s13, %s649_s13 }
  0x3c   :  { %p852_p2 = scmp.ne.s32.totalorder %s649_s13, %s851_s14  ;;  %p857_p4 = scmp.lt.s32.totalorder %s851_s14, %s851_s14 }
  0x3e   :  { %387 = vmatpush1.bf16.msra.mxu0 %v769_v23  ;;  %460 = vmatpush1.bf16.msra.mxu1 %v770_v24  ;;  %p858_p5 = por %p857_p4, %p856_p3 }
  0x3f   :  { %388 = vmatprep.subr.bf16.mxu0 %v771_v25  ;;  %461 = vmatprep.subr.bf16.mxu1 %v773_v26 }
  0x40   :  { %p859_p6 = pnand %p858_p5, %p852_p2 }
  0x42   :  { %389 = vmatpush1.bf16.msra.mxu0 %v775_v27  ;;  %462 = vmatpush1.bf16.msra.mxu1 %v776_v28 }
  0x43   :  { %390 = vmatprep.subr.bf16.mxu0 %v777_v29  ;;  %463 = vmatprep.subr.bf16.mxu1 %v779_v30 }
  0x46   :  { %391 = vmatpush1.bf16.msra.mxu0 %v781_v31  ;;  %464 = vmatpush1.bf16.msra.mxu1 %v782_v32 }
  0x47   :  { %522 = vmatprep.subr.bf16.mxu0 %v785_v35  ;;  %709 = vmatprep.subr.bf16.mxu1 %v785_v35 }
  0x49   :  { %409 = vmatmul.mubr.bf16.vlgmr.msra.gmra.mrb[0].mxu0 %v935_v36  ;;  %482 = vmatmul.mubr.bf16.vlgmr.msra.gmra.mrb[0].mxu1 %v935_v36 }
  0x4a   :  { %523 = vmatpush1.bf16.msra.mxu0 %v783_v37  ;;  %717 = vmatpush1.bf16.msra.mxu1 %v783_v37 }
  0x4b   :  { %524 = vmatprep.subr.bf16.mxu0 %v788_v38  ;;  %710 = vmatprep.subr.bf16.mxu1 %v788_v38 }
  0x4c   :  { %418 = vmatprep.mubr.bf16.mxu0 %v885_v0  ;;  %491 = vmatprep.mubr.bf16.mxu1 %v885_v0 }
  0x4e   :  { %525 = vmatpush1.bf16.msra.mxu0 %v786_v39  ;;  %718 = vmatpush1.bf16.msra.mxu1 %v786_v39 }
  0x4f   :  { %526 = vmatprep.subr.bf16.mxu0 %v791_v42  ;;  %711 = vmatprep.subr.bf16.mxu1 %v791_v42 }
  0x51   :  { %419 = vmatmul.mubr.bf16.gmra.mrb[4].mxu0 %v53_v43  ;;  %492 = vmatmul.mubr.bf16.gmra.mrb[4].mxu1 %v53_v43 }
  0x52   :  { %527 = vmatpush1.bf16.msra.mxu0 %v789_v44  ;;  %719 = vmatpush1.bf16.msra.mxu1 %v789_v44 }
  0x53   :  { %528 = vmatprep.subr.bf16.mxu0 %v794_v45  ;;  %712 = vmatprep.subr.bf16.mxu1 %v794_v45 }
  0x54   :  { %428 = vmatprep.mubr.bf16.mxu0 %v885_v0  ;;  %501 = vmatprep.mubr.bf16.mxu1 %v885_v0 }
  0x56   :  { %529 = vmatpush1.bf16.msra.mxu0 %v792_v46  ;;  %720 = vmatpush1.bf16.msra.mxu1 %v792_v46 }
  0x57   :  { %530 = vmatprep.subr.bf16.mxu0 %v797_v49  ;;  %713 = vmatprep.subr.bf16.mxu1 %v797_v49 }
  0x59   :  { %429 = vmatmul.mubr.bf16.gmra.mrb[8].mxu0 %v54_v50  ;;  %502 = vmatmul.mubr.bf16.gmra.mrb[8].mxu1 %v54_v50 }
  0x5a   :  { %531 = vmatpush1.bf16.msra.mxu0 %v795_v51  ;;  %721 = vmatpush1.bf16.msra.mxu1 %v795_v51 }
  0x5b   :  { %532 = vmatprep.subr.bf16.mxu0 %v800_v52  ;;  %714 = vmatprep.subr.bf16.mxu1 %v800_v52 }
  0x5c   :  { %438 = vmatprep.mubr.bf16.mxu0 %v885_v0  ;;  %511 = vmatprep.mubr.bf16.mxu1 %v885_v0 }
  0x5e   :  { %533 = vmatpush1.bf16.msra.mxu0 %v798_v53  ;;  %722 = vmatpush1.bf16.msra.mxu1 %v798_v53 }
  0x5f   :  { %534 = vmatprep.subr.bf16.mxu0 %v803_v56  ;;  %715 = vmatprep.subr.bf16.mxu1 %v803_v56 }
  0x61   :  { %439 = vmatmul.mubr.bf16.gmra.mrb[12].mxu0 %v55_v57  ;;  %512 = vmatmul.mubr.bf16.gmra.mrb[12].mxu1 %v55_v57 }
  0x62   :  { %535 = vmatpush1.bf16.msra.mxu0 %v801_v58  ;;  %723 = vmatpush1.bf16.msra.mxu1 %v801_v58 }
  0x63   :  { %536 = vmatprep.subr.bf16.mxu0 %v806_v59  ;;  %716 = vmatprep.subr.bf16.mxu1 %v806_v59 }
  0x64   :  { %554 = vmatprep.mubr.bf16.mxu0 %v885_v0  ;;  %574 = vmatprep.mubr.bf16.mxu1 %v885_v0 }
  0x66   :  { %537 = vmatpush1.bf16.msra.mxu0 %v804_v60  ;;  %724 = vmatpush1.bf16.msra.mxu1 %v804_v60 }
  0x69   :  { %555 = vmatmul.mubr.bf16.vlgmr.msra.gmra.mrb[16].mxu0 %v935_v36  ;;  %575 = vmatmul.mubr.bf16.vlgmr.msra.gmra.mrb[16].mxu1 %v54_v50 }
  0x6a   :  { %564 = vmatprep.mubr.bf16.mxu0 %v885_v0  ;;  %584 = vmatprep.mubr.bf16.mxu1 %v885_v0  ;;  %v962_v0 = vrot.slane %v957_v2, %v108_v63  ;;  %v124_v63 = vsub.s32 4, %v950_v62 }
  0x71   :  { %565 = vmatmul.mubr.bf16.gmra.mrb[20].mxu0 %v53_v43  ;;  %585 = vmatmul.mubr.bf16.gmra.mrb[20].mxu1 %v55_v57 }
 0x11c   :  { %v410_v8 = vpop.f32.mrb[0].mxu0  ;;  %v483_v9 = vpop.f32.mrb[0].mxu1 }
 0x11d   :  { %v411_v10 = vadd.f32 %v410_v8, %v962_v0  ;;  %v484_v11 = vadd.f32 %v483_v9, %v965_v5  ;;  %v412_v12 = vpop.f32.mrb[1].mxu0  ;;  %v485_v13 = vpop.f32.mrb[1].mxu1  ;;  %v128_v9 = vsub.s32 5, %v950_v62 }
 0x11e   :  { %v413_v14 = vadd.f32 %v412_v12, %v968_v6  ;;  %v486_v15 = vadd.f32 %v485_v13, %v971_v7  ;;  %v414_v16 = vpop.f32.mrb[2].mxu0  ;;  %v487_v17 = vpop.f32.mrb[2].mxu1 }
 0x11f   :  { %595 = vst [vmem:[#allocation7] sm:$0xff] %v411_v10  ;;  %597 = vst [vmem:[#allocation7 + $0x10] sm:$0xff] %v484_v11  ;;  %v415_v18 = vadd.f32 %v414_v16, %v962_v0  ;;  %v488_v19 = vadd.f32 %v487_v17, %v965_v5  ;;  %v416_v20 = vpop.f32.mrb[3].mxu0  ;;  %v489_v21 = vpop.f32.mrb[3].mxu1  ;;  %v125_v16 = vrot.slane %v957_v2, %v124_v63 }
 0x120   :  { %596 = vst [vmem:[#allocation7 + $0x8] sm:$0xff] %v413_v14  ;;  %598 = vst [vmem:[#allocation7 + $0x18] sm:$0xff] %v486_v15  ;;  %v417_v22 = vadd.f32 %v416_v20, %v968_v6  ;;  %v490_v23 = vadd.f32 %v489_v21, %v971_v7  ;;  %v129_v62 = vrot.slane %v957_v2, %v128_v9 }
 0x121   :  { %601 = vst [vmem:[#allocation7 + $0x30] sm:$0xff] %v415_v18  ;;  %603 = vst [vmem:[#allocation7 + $0x40] sm:$0xff] %v488_v19 }
 0x122   :  { %602 = vst [vmem:[#allocation7 + $0x38] sm:$0xff] %v417_v22  ;;  %604 = vst [vmem:[#allocation7 + $0x48] sm:$0xff] %v490_v23 }
 0x124   :  { %v420_v24 = vpop.f32.mrb[4].mxu0  ;;  %v493_v25 = vpop.f32.mrb[4].mxu1 }
 0x125   :  { %v421_v26 = vadd.f32 %v420_v24, %v962_v0  ;;  %v494_v27 = vadd.f32 %v493_v25, %v965_v5  ;;  %v422_v28 = vpop.f32.mrb[5].mxu0  ;;  %v495_v29 = vpop.f32.mrb[5].mxu1 }
 0x126   :  { %v423_v30 = vadd.f32 %v422_v28, %v968_v6  ;;  %v496_v31 = vadd.f32 %v495_v29, %v971_v7  ;;  %v424_v32 = vpop.f32.mrb[6].mxu0  ;;  %v497_v33 = vpop.f32.mrb[6].mxu1 }
 0x127   :  { %607 = vst [vmem:[#allocation7 + $0x60] sm:$0xff] %v421_v26  ;;  %609 = vst [vmem:[#allocation7 + $0x70] sm:$0xff] %v494_v27  ;;  %v425_v34 = vadd.f32 %v424_v32, %v962_v0  ;;  %v498_v35 = vadd.f32 %v497_v33, %v965_v5  ;;  %v426_v36 = vpop.f32.mrb[7].mxu0  ;;  %v499_v37 = vpop.f32.mrb[7].mxu1 }
 0x128   :  { %608 = vst [vmem:[#allocation7 + $0x68] sm:$0xff] %v423_v30  ;;  %610 = vst [vmem:[#allocation7 + $0x78] sm:$0xff] %v496_v31  ;;  %v427_v38 = vadd.f32 %v426_v36, %v968_v6  ;;  %v500_v39 = vadd.f32 %v499_v37, %v971_v7 }
 0x129   :  { %613 = vst [vmem:[#allocation7 + $0x90] sm:$0xff] %v425_v34  ;;  %615 = vst [vmem:[#allocation7 + $0xa0] sm:$0xff] %v498_v35 }
 0x12a   :  { %614 = vst [vmem:[#allocation7 + $0x98] sm:$0xff] %v427_v38  ;;  %616 = vst [vmem:[#allocation7 + $0xa8] sm:$0xff] %v500_v39 }
 0x12c   :  { %v430_v40 = vpop.f32.mrb[8].mxu0  ;;  %v503_v41 = vpop.f32.mrb[8].mxu1 }
 0x12d   :  { %v431_v42 = vadd.f32 %v430_v40, %v962_v0  ;;  %v504_v43 = vadd.f32 %v503_v41, %v965_v5  ;;  %v432_v44 = vpop.f32.mrb[9].mxu0  ;;  %v505_v45 = vpop.f32.mrb[9].mxu1 }
 0x12e   :  { %v433_v46 = vadd.f32 %v432_v44, %v968_v6  ;;  %v506_v47 = vadd.f32 %v505_v45, %v971_v7  ;;  %v434_v48 = vpop.f32.mrb[10].mxu0  ;;  %v507_v49 = vpop.f32.mrb[10].mxu1 }
 0x12f   :  { %619 = vst [vmem:[#allocation7 + $0xc0] sm:$0xff] %v431_v42  ;;  %621 = vst [vmem:[#allocation7 + $0xd0] sm:$0xff] %v504_v43  ;;  %v435_v50 = vadd.f32 %v434_v48, %v962_v0  ;;  %v508_v51 = vadd.f32 %v507_v49, %v965_v5  ;;  %v436_v52 = vpop.f32.mrb[11].mxu0  ;;  %v509_v53 = vpop.f32.mrb[11].mxu1 }
 0x130   :  { %620 = vst [vmem:[#allocation7 + $0xc8] sm:$0xff] %v433_v46  ;;  %622 = vst [vmem:[#allocation7 + $0xd8] sm:$0xff] %v506_v47  ;;  %v437_v54 = vadd.f32 %v436_v52, %v968_v6  ;;  %v510_v55 = vadd.f32 %v509_v53, %v971_v7 }
 0x131   :  { %625 = vst [vmem:[#allocation7 + $0xf0] sm:$0xff] %v435_v50  ;;  %627 = vst [vmem:[#allocation7 + $0x100] sm:$0xff] %v508_v51 }
 0x132   :  { %626 = vst [vmem:[#allocation7 + $0xf8] sm:$0xff] %v437_v54  ;;  %628 = vst [vmem:[#allocation7 + $0x108] sm:$0xff] %v510_v55 }
 0x134   :  { %v440_v56 = vpop.f32.mrb[12].mxu0  ;;  %v513_v57 = vpop.f32.mrb[12].mxu1 }
 0x135   :  { %v441_v58 = vadd.f32 %v440_v56, %v962_v0  ;;  %v514_v59 = vadd.f32 %v513_v57, %v965_v5  ;;  %v442_v60 = vpop.f32.mrb[13].mxu0  ;;  %v515_v61 = vpop.f32.mrb[13].mxu1 }
 0x136   :  { %v443_v1 = vadd.f32 %v442_v60, %v968_v6  ;;  %v516_v3 = vadd.f32 %v515_v61, %v971_v7  ;;  %v444_v4 = vpop.f32.mrb[14].mxu0  ;;  %v517_v8 = vpop.f32.mrb[14].mxu1 }
 0x137   :  { %631 = vst [vmem:[#allocation7 + $0x120] sm:$0xff] %v441_v58  ;;  %633 = vst [vmem:[#allocation7 + $0x130] sm:$0xff] %v514_v59  ;;  %v445_v10 = vadd.f32 %v444_v4, %v962_v0  ;;  %v518_v11 = vadd.f32 %v517_v8, %v965_v5  ;;  %v446_v12 = vpop.f32.mrb[15].mxu0  ;;  %v519_v13 = vpop.f32.mrb[15].mxu1 }
 0x138   :  { %632 = vst [vmem:[#allocation7 + $0x128] sm:$0xff] %v443_v1  ;;  %634 = vst [vmem:[#allocation7 + $0x138] sm:$0xff] %v516_v3  ;;  %v447_v14 = vadd.f32 %v446_v12, %v968_v6  ;;  %v520_v15 = vadd.f32 %v519_v13, %v971_v7 }
 0x139   :  { %637 = vst [vmem:[#allocation7 + $0x150] sm:$0xff] %v445_v10  ;;  %639 = vst [vmem:[#allocation7 + $0x160] sm:$0xff] %v518_v11 }
 0x13a   :  { %638 = vst [vmem:[#allocation7 + $0x158] sm:$0xff] %v447_v14  ;;  %640 = vst [vmem:[#allocation7 + $0x168] sm:$0xff] %v520_v15 }
 0x13c   :  { %v556_v17 = vpop.f32.mrb[16].mxu0  ;;  %v576_v0 = vpop.f32.mrb[16].mxu1 }
 0x13d   :  { %v557_v18 = vadd.f32 %v556_v17, %v125_v16  ;;  %v577_v5 = vadd.f32 %v576_v0, %v125_v16  ;;  %v558_v19 = vpop.f32.mrb[17].mxu0  ;;  %v578_v20 = vpop.f32.mrb[17].mxu1 }
 0x13e   :  { %v559_v21 = vadd.f32 %v558_v19, %v129_v62  ;;  %v579_v22 = vadd.f32 %v578_v20, %v129_v62  ;;  %v560_v23 = vpop.f32.mrb[18].mxu0  ;;  %v580_v6 = vpop.f32.mrb[18].mxu1 }
 0x13f   :  { %599 = vst [vmem:[#allocation7 + $0x20] sm:$0xff] %v557_v18  ;;  %623 = vst [vmem:[#allocation7 + $0xe0] sm:$0xff] %v577_v5  ;;  %v561_v7 = vadd.f32 %v560_v23, %v125_v16  ;;  %v581_v24 = vadd.f32 %v580_v6, %v125_v16  ;;  %v562_v25 = vpop.f32.mrb[19].mxu0  ;;  %v582_v26 = vpop.f32.mrb[19].mxu1 }
 0x140   :  { %600 = vst [vmem:[#allocation7 + $0x28] sm:$0xff] %v559_v21  ;;  %624 = vst [vmem:[#allocation7 + $0xe8] sm:$0xff] %v579_v22  ;;  %v563_v27 = vadd.f32 %v562_v25, %v129_v62  ;;  %v583_v2 = vadd.f32 %v582_v26, %v129_v62 }
 0x141   :  { %605 = vst [vmem:[#allocation7 + $0x50] sm:$0xff] %v561_v7  ;;  %629 = vst [vmem:[#allocation7 + $0x110] sm:$0xff] %v581_v24 }
 0x142   :  { %606 = vst [vmem:[#allocation7 + $0x58] sm:$0xff] %v563_v27  ;;  %630 = vst [vmem:[#allocation7 + $0x118] sm:$0xff] %v583_v2 }
 0x144   :  { %v566_v28 = vpop.f32.mrb[20].mxu0  ;;  %v586_v29 = vpop.f32.mrb[20].mxu1 }
 0x145   :  { %v567_v30 = vadd.f32 %v566_v28, %v125_v16  ;;  %v587_v31 = vadd.f32 %v586_v29, %v125_v16  ;;  %v568_v32 = vpop.f32.mrb[21].mxu0  ;;  %v588_v33 = vpop.f32.mrb[21].mxu1 }
 0x146   :  { %v569_v34 = vadd.f32 %v568_v32, %v129_v62  ;;  %v589_v35 = vadd.f32 %v588_v33, %v129_v62  ;;  %v570_v36 = vpop.f32.mrb[22].mxu0  ;;  %v590_v37 = vpop.f32.mrb[22].mxu1 }
 0x147   :  { %611 = vst [vmem:[#allocation7 + $0x80] sm:$0xff] %v567_v30  ;;  %635 = vst [vmem:[#allocation7 + $0x140] sm:$0xff] %v587_v31  ;;  %v571_v38 = vadd.f32 %v570_v36, %v125_v16  ;;  %v591_v39 = vadd.f32 %v590_v37, %v125_v16  ;;  %v572_v40 = vpop.f32.mrb[23].mxu0  ;;  %v592_v41 = vpop.f32.mrb[23].mxu1 }
 0x148   :  { %612 = vst [vmem:[#allocation7 + $0x88] sm:$0xff] %v569_v34  ;;  %636 = vst [vmem:[#allocation7 + $0x148] sm:$0xff] %v589_v35  ;;  %v573_v42 = vadd.f32 %v572_v40, %v129_v62  ;;  %v593_v43 = vadd.f32 %v592_v41, %v129_v62 }
 0x149   :  { %617 = vst [vmem:[#allocation7 + $0xb0] sm:$0xff] %v571_v38  ;;  %641 = vst [vmem:[#allocation7 + $0x170] sm:$0xff] %v591_v39 }
 0x14a   :  { %618 = vst [vmem:[#allocation7 + $0xb8] sm:$0xff] %v573_v42  ;;  %642 = vst [vmem:[#allocation7 + $0x178] sm:$0xff] %v593_v43 }
 0x14b   :  { %862 = shalt.err (!%p859_p6)
}
 0x14c   :  { %s863_s17 = scalar_lea.hbm %s1024_s3, 6144 }
 0x14d   :  { %p864_p7 = scmp.ne.s32.totalorder %s1024_s3, %s863_s17  ;;  %p867_p8 = scmp.lt.u32.totalorder %s863_s17, %s1024_s3 }
 0x14f   :  { %p869_p9 = pnand %p867_p8, %p864_p7 }
 0x151   :  { %872 = shalt.err (!%p869_p9)
}
 0x152   :  { %s887_s22 = smov 768   ;;  %s888_s23 = smov 48  }
 0x153   :  { %654 = dma.vmem_to_hbm [thread:$0]  %s649_s13, 6144, %s1024_s3, [#allocation4], %s887_s22, %s887_s22, %s888_s23  }
 0x154   :  { %877 = dma.done.wait [#allocation4], 6144  }
 0x155   :  { %878 = vsyncadd [#allocation4], 4294961152 }
 0x156   :  { %658 = vsyncpa [#allocation3], 1 }
 0x157   :  { %659 = vsyncpa [#allocation6], 1 }
 0x158   :  { %660 = vsyncpa [#allocation4], 1 }

</bundles_post_ra>
